<compile_context>
chip_gen: v6e
topology: v6e:2x2x1
jax: 0.10.0
libtpu: 0.0.40
codegen_flags: <defaults>
</compile_context>

<pallas_src>
import functools
import math

import jax
import jax.numpy as jnp
from jax.experimental import pallas as pl
from jax.experimental.pallas import tpu as pltpu

# ---------------------------------------------------------------- config ----
EMB = 192          # embedding_size (module default)
N_SPK = 64         # n_speakers (small synthetic)
N_EMO = 8          # n_emotions (small synthetic)
HIDDEN = 128       # emotion head hidden size (fixed in module)
MARGIN = 0.2
SCALE = 30.0
SPEAKER_COEF = 1.0
EMOTION_COEF = 1.0
MAX_ALPHA = 0.4
N_EPOCHS = 20
EPOCH_LEN = 200
TOTAL_STEPS = N_EPOCHS * EPOCH_LEN

COS_M = math.cos(MARGIN)
SIN_M = math.sin(MARGIN)
TH = math.cos(math.pi - MARGIN)
MM = math.sin(math.pi - MARGIN) * MARGIN
# F.normalize eps.  Must stay > 0: padded zero rows of w_spk rely on
# rsqrt(max(0, EPS^2)) * 0 == (1/EPS) * 0 == 0; EPS == 0 would give inf*0=NaN.
EPS = 1e-12
NEG_INF = -1e30    # mask value for padded (speaker / emotion) classes
LANES = 128        # TPU lane width; pad class dims to a multiple of this


def _vmem_spec():
    return pl.BlockSpec(memory_space=pltpu.MemorySpace.VMEM)


def _pad_to_lanes(n):
    return ((n + LANES - 1) // LANES) * LANES


# --------------------------------------------------------- fused kernel -----
def _fused_loss_kernel(n_valid_spk, n_valid_emo, emit_logits,
                       emb_ref, w_spk_ref, w1_ref, b1_ref, w2_ref, b2_ref,
                       spk_lbl_ref, emo_lbl_ref, *out_refs):
    if emit_logits:
        spk_logits_ref, emo_logits_ref, loss_ref = out_refs
    else:
        (loss_ref,) = out_refs

    x = emb_ref[...]                       # (B, E)      f32
    w = w_spk_ref[...]                     # (S_PAD, E)  f32 (zero-padded rows)
    b = x.shape[0]

    # ---------------- speaker AAM branch ----------------
    # F.normalize: x / max(||x||, eps) == x * rsqrt(max(||x||^2, eps^2))  (EUP)
    xn = x * jax.lax.rsqrt(
        jnp.maximum(jnp.sum(x * x, axis=-1, keepdims=True), EPS * EPS))
    wn = w * jax.lax.rsqrt(
        jnp.maximum(jnp.sum(w * w, axis=-1, keepdims=True), EPS * EPS))

    # NT contraction on the last dims: (B,E)x(S_PAD,E) -> (B,S_PAD).
    # bf16 MXU inputs, f32 accumulation; no materialized weight transpose.
    cosine = jax.lax.dot_general(
        xn.astype(jnp.bfloat16), wn.astype(jnp.bfloat16),
        (((1,), (1,)), ((), ())), preferred_element_type=jnp.float32)
    sine = jnp.sqrt(jnp.clip(1.0 - cosine * cosine, 0.0, 1.0))
    phi = cosine * COS_M - sine * SIN_M
    phi = jnp.where((cosine - TH) > 0, phi, cosine - MM)   # easy_margin=False

    spk_labels = spk_lbl_ref[...]          # (B, 1) int32
    col = jax.lax.broadcasted_iota(jnp.int32, cosine.shape, 1)
    is_tgt = col == spk_labels
    spk_out = jnp.where(is_tgt, phi, cosine) * SCALE       # single select
    if n_valid_spk != cosine.shape[1]:
        # mask padded classes so CE over the padded slab matches the real one
        spk_out = jnp.where(col < n_valid_spk, spk_out, NEG_INF)
    if emit_logits:
        spk_logits_ref[...] = spk_out                      # (B, S_PAD)

    m = jnp.max(spk_out, axis=-1, keepdims=True)
    lse = m + jnp.log(jnp.sum(jnp.exp(spk_out - m), axis=-1, keepdims=True))
    tgt = jnp.sum(jnp.where(is_tgt, spk_out, 0.0), axis=-1, keepdims=True)
    spk_per = lse - tgt                                    # (B, 1)

    # ---------------- emotion head (revgrad == identity fwd) ----------------
    h = (jnp.dot(x.astype(jnp.bfloat16), w1_ref[...],
                 preferred_element_type=jnp.float32) + b1_ref[...])
    h = jnp.maximum(h, 0.0)                                # ReLU
    # Dropout(p=0.3) -> identity (eval semantics).
    # TODO(synk): training-mode stochastic dropout mask not implemented.
    emo_logits = (jnp.dot(h.astype(jnp.bfloat16), w2_ref[...],
                          preferred_element_type=jnp.float32) + b2_ref[...])
    if emit_logits:
        emo_logits_ref[...] = emo_logits                   # (B, C_PAD)

    emo_labels = emo_lbl_ref[...]                          # (B, 1) int32
    ecol = jax.lax.broadcasted_iota(jnp.int32, emo_logits.shape, 1)
    e_is_tgt = ecol == emo_labels
    emo_masked = emo_logits
    if n_valid_emo != emo_logits.shape[1]:
        emo_masked = jnp.where(ecol < n_valid_emo, emo_logits, NEG_INF)
    em = jnp.max(emo_masked, axis=-1, keepdims=True)
    e_lse = em + jnp.log(jnp.sum(jnp.exp(emo_masked - em), axis=-1,
                                 keepdims=True))
    e_tgt = jnp.sum(jnp.where(e_is_tgt, emo_masked, 0.0), axis=-1,
                    keepdims=True)
    emo_per = e_lse - e_tgt                                # (B, 1)

    # -------- in-kernel mean + weighted total, one lane-dense (1,128) slab --
    inv_b = 1.0 / b
    spk_mean = jnp.sum(spk_per, axis=0, keepdims=True) * inv_b     # (1, 1)
    emo_mean = jnp.sum(emo_per, axis=0, keepdims=True) * inv_b     # (1, 1)
    total = SPEAKER_COEF * spk_mean + EMOTION_COEF * emo_mean      # (1, 1)
    lane = jax.lax.broadcasted_iota(jnp.int32, (1, LANES), 1)
    loss_ref[...] = (jnp.where(lane == 0, spk_mean, 0.0)
                     + jnp.where(lane == 1, emo_mean, 0.0)
                     + jnp.where(lane == 2, total, 0.0))


# ------------------------------------------------------------- forward ------
def get_alpha(step):
    # step stays a static Python number here; use jnp.exp if it is ever traced.
    p = step / TOTAL_STEPS
    return MAX_ALPHA * (2.0 / (1.0 + math.exp(-10.0 * p)) - 1.0)


def emotion_gr_loss_forward(params, embeddings, labels, emo_labels,
                            current_step=0, return_logits=True):
    # forward increments the step buffer before computing alpha
    step = current_step + 1
    alpha = get_alpha(step)

    B, E = embeddings.shape
    w_spk = params["spk_weight"].astype(jnp.float32)
    S = w_spk.shape[0]
    S_PAD = _pad_to_lanes(S)
    if S_PAD != S:
        w_spk = jnp.pad(w_spk, ((0, S_PAD - S), (0, 0)))   # lane-dense logits

    C = params["w2"].shape[1]
    C_PAD = _pad_to_lanes(C)
    w2 = params["w2"]
    b2 = params["b2"]
    if C_PAD != C:
        w2 = jnp.pad(w2, ((0, 0), (0, C_PAD - C)))         # lane-dense emo head
        b2 = jnp.pad(b2, ((0, 0), (0, C_PAD - C)))

    # bf16 weights for the MXU contractions (f32 accumulation in-kernel).
    w1_bf16 = params["w1"].astype(jnp.bfloat16)
    w2_bf16 = w2.astype(jnp.bfloat16)

    flops = 2 * B * E * S_PAD + 2 * B * E * HIDDEN + 2 * B * HIDDEN * C_PAD
    transcendentals = (B * (S_PAD + C_PAD)     # exp (two LSEs)
                       + B * S_PAD             # sqrt (sine)
                       + 2 * B                 # log
                       + B + S_PAD)            # rsqrt (normalize)
    in_bytes = (4 * B * E + 4 * S_PAD * E + 2 * E * HIDDEN + 4 * HIDDEN
                + 2 * HIDDEN * C_PAD + 4 * C_PAD + 2 * 4 * B)
    out_bytes = 4 * LANES + (4 * B * (S_PAD + C_PAD) if return_logits else 0)
    bytes_accessed = in_bytes + out_bytes

    kernel = functools.partial(_fused_loss_kernel, S, C, return_logits)

    if return_logits:
        out_shape = (
            jax.ShapeDtypeStruct((B, S_PAD), jnp.float32),   # speaker logits
            jax.ShapeDtypeStruct((B, C_PAD), jnp.float32),   # emotion logits
            jax.ShapeDtypeStruct((1, LANES), jnp.float32),   # loss slab
        )
    else:
        out_shape = (jax.ShapeDtypeStruct((1, LANES), jnp.float32),)

    # Explicit scoped-VMEM limit (v5e default is only 16 MiB); keep inside the
    # v7x physical 64 MiB.
    vmem_limit = int(min(64 * 1024 * 1024,
                         max(4 * 1024 * 1024, 4 * (in_bytes + out_bytes))))

    outs = pl.pallas_call(
        kernel,
        out_shape=out_shape,
        in_specs=[_vmem_spec()] * 8,
        out_specs=(_vmem_spec(),) * len(out_shape),
        compiler_params=pltpu.CompilerParams(vmem_limit_bytes=vmem_limit),
        cost_estimate=pl.CostEstimate(flops=flops,
                                      transcendentals=transcendentals,
                                      bytes_accessed=bytes_accessed),
    )(embeddings.astype(jnp.float32), w_spk,
      w1_bf16, params["b1"], w2_bf16, b2,
      labels.reshape(B, 1).astype(jnp.int32),
      emo_labels.reshape(B, 1).astype(jnp.int32))

    if return_logits:
        spk_logits_pad, emo_logits_pad, loss_slab = outs
        spk_logits = spk_logits_pad[:, :S] if S_PAD != S else spk_logits_pad
        emo_logits = emo_logits_pad[:, :C] if C_PAD != C else emo_logits_pad
    else:
        (loss_slab,) = outs
        spk_logits = None
        emo_logits = None

    return {
        "loss": loss_slab[0, 2],
        "speaker_loss": loss_slab[0, 0],
        "emotion_loss": loss_slab[0, 1],
        "logits": spk_logits,
        "emo_logits": emo_logits,
        "alpha": alpha,
    }


# -------------------------------------------------------- param init --------
def init_params(key):
    k_spk, k_w1, k_b1, k_w2, k_b2 = jax.random.split(key, 5)
    # AAMsoftmax weight (n_speakers, E): xavier_normal_
    xav_std = math.sqrt(2.0 / (N_SPK + EMB))
    spk_weight = xav_std * jax.random.normal(k_spk, (N_SPK, EMB), jnp.float32)
    # Linear(192,128): stored input-major (E, H) so kernel does x @ W
    b1_bound = 1.0 / math.sqrt(EMB)
    w1 = jax.random.uniform(k_w1, (EMB, HIDDEN), jnp.float32, -b1_bound, b1_bound)
    b1 = jax.random.uniform(k_b1, (1, HIDDEN), jnp.float32, -b1_bound, b1_bound)
    # Linear(128, n_emotions): stored (H, C)
    b2_bound = 1.0 / math.sqrt(HIDDEN)
    w2 = jax.random.uniform(k_w2, (HIDDEN, N_EMO), jnp.float32, -b2_bound, b2_bound)
    b2 = jax.random.uniform(k_b2, (1, N_EMO), jnp.float32, -b2_bound, b2_bound)
    return {"spk_weight": spk_weight, "w1": w1, "b1": b1, "w2": w2, "b2": b2}


# ----------------------------------------------------------------- main -----
if __name__ == "__main__":
    B = 8
    key = jax.random.PRNGKey(0)
    k_param, k_emb, k_lbl, k_emo = jax.random.split(key, 4)

    params = init_params(k_param)
    embeddings = jax.random.normal(k_emb, (B, EMB), jnp.float32)
    labels = jax.random.randint(k_lbl, (B,), 0, N_SPK, jnp.int32)
    emo_labels = jax.random.randint(k_emo, (B,), 0, N_EMO, jnp.int32)

    # Full forward (module semantics: returns logits + losses).
    out = emotion_gr_loss_forward(params, embeddings, labels, emo_labels,
                                  current_step=0)
    jax.block_until_ready(out["loss"])
    jax.block_until_ready(out["logits"])
    jax.block_until_ready(out["emo_logits"])

    # Loss-only fast path (no logits writeback) for steps that only need the
    # scalars.
    out_fast = emotion_gr_loss_forward(params, embeddings, labels, emo_labels,
                                       current_step=0, return_logits=False)
    jax.block_until_ready(out_fast["loss"])

    print("KERNEL_OK")
</pallas_src>

<mosaic_0001>
module attributes {stable_mosaic.version = 11 : i64} {
  func.func @_fused_loss_kernel(%arg0: memref<8x192xf32, #tpu.memory_space<vmem>>, %arg1: memref<128x192xf32, #tpu.memory_space<vmem>>, %arg2: memref<192x128xbf16, #tpu.memory_space<vmem>>, %arg3: memref<1x128xf32, #tpu.memory_space<vmem>>, %arg4: memref<128x128xbf16, #tpu.memory_space<vmem>>, %arg5: memref<1x128xf32, #tpu.memory_space<vmem>>, %arg6: memref<8x1xi32, #tpu.memory_space<vmem>>, %arg7: memref<8x1xi32, #tpu.memory_space<vmem>>, %arg8: memref<8x128xf32, #tpu.memory_space<vmem>>, %arg9: memref<8x128xf32, #tpu.memory_space<vmem>>, %arg10: memref<1x128xf32, #tpu.memory_space<vmem>>) attributes {dimension_semantics = [], scalar_prefetch = 0 : i64, scratch_operands = 0 : i64, tpu.core_type = #tpu.core_type<tc>} {
    %c0 = arith.constant 0 : index
    %c0_0 = arith.constant 0 : index
    %0 = vector.load %arg0[%c0, %c0_0] : memref<8x192xf32, #tpu.memory_space<vmem>>, vector<8x192xf32>
    %c0_1 = arith.constant 0 : index
    %c0_2 = arith.constant 0 : index
    %1 = vector.load %arg1[%c0_1, %c0_2] : memref<128x192xf32, #tpu.memory_space<vmem>>, vector<128x192xf32>
    %2 = arith.mulf %0, %0 : vector<8x192xf32>
    %cst = arith.constant dense<0.000000e+00> : vector<8xf32>
    %3 = vector.multi_reduction <add>, %2, %cst [1] : vector<8x192xf32> to vector<8xf32>
    %4 = vector.shape_cast %3 : vector<8xf32> to vector<8x1xf32>
    %cst_3 = arith.constant 1.000000e-24 : f32
    %5 = vector.broadcast %cst_3 : f32 to vector<8x1xf32>
    %6 = arith.maximumf %4, %5 : vector<8x1xf32>
    %7 = math.rsqrt %6 : vector<8x1xf32>
    %8 = vector.broadcast %7 : vector<8x1xf32> to vector<8x192xf32>
    %9 = arith.mulf %0, %8 : vector<8x192xf32>
    %10 = arith.mulf %1, %1 : vector<128x192xf32>
    %cst_4 = arith.constant dense<0.000000e+00> : vector<128xf32>
    %11 = vector.multi_reduction <add>, %10, %cst_4 [1] : vector<128x192xf32> to vector<128xf32>
    %12 = vector.shape_cast %11 : vector<128xf32> to vector<128x1xf32>
    %cst_5 = arith.constant 1.000000e-24 : f32
    %13 = vector.broadcast %cst_5 : f32 to vector<128x1xf32>
    %14 = arith.maximumf %12, %13 : vector<128x1xf32>
    %15 = math.rsqrt %14 : vector<128x1xf32>
    %16 = vector.broadcast %15 : vector<128x1xf32> to vector<128x192xf32>
    %17 = arith.mulf %1, %16 : vector<128x192xf32>
    %18 = arith.truncf %9 : vector<8x192xf32> to vector<8x192xbf16>
    %19 = arith.truncf %17 : vector<128x192xf32> to vector<128x192xbf16>
    %cst_6 = arith.constant dense<0.000000e+00> : vector<8x128xf32>
    %20 = tpu.matmul %18, %19, %cst_6 {dimension_numbers = #tpu.dot_dimension_numbers<[1], [1], [0], [0], [0, 0, 1, 0], [], []>} : vector<8x192xbf16>, vector<128x192xbf16>, vector<8x128xf32> -> vector<8x128xf32>
    %21 = arith.mulf %20, %20 : vector<8x128xf32>
    %cst_7 = arith.constant 1.000000e+00 : f32
    %22 = vector.broadcast %cst_7 : f32 to vector<8x128xf32>
    %23 = arith.subf %22, %21 : vector<8x128xf32>
    %cst_8 = arith.constant 0.000000e+00 : f32
    %cst_9 = arith.constant 1.000000e+00 : f32
    %24 = vector.broadcast %cst_8 : f32 to vector<8x128xf32>
    %25 = arith.maximumf %24, %23 : vector<8x128xf32>
    %26 = vector.broadcast %cst_9 : f32 to vector<8x128xf32>
    %27 = arith.minimumf %26, %25 : vector<8x128xf32>
    %28 = math.sqrt %27 : vector<8x128xf32>
    %cst_10 = arith.constant 0.980066597 : f32
    %29 = vector.broadcast %cst_10 : f32 to vector<8x128xf32>
    %30 = arith.mulf %20, %29 : vector<8x128xf32>
    %cst_11 = arith.constant 0.198669329 : f32
    %31 = vector.broadcast %cst_11 : f32 to vector<8x128xf32>
    %32 = arith.mulf %28, %31 : vector<8x128xf32>
    %33 = arith.subf %30, %32 : vector<8x128xf32>
    %cst_12 = arith.constant -0.980066597 : f32
    %34 = vector.broadcast %cst_12 : f32 to vector<8x128xf32>
    %35 = arith.subf %20, %34 : vector<8x128xf32>
    %cst_13 = arith.constant 0.000000e+00 : f32
    %36 = vector.broadcast %cst_13 : f32 to vector<8x128xf32>
    %37 = arith.cmpf ogt, %35, %36 : vector<8x128xf32>
    %cst_14 = arith.constant 0.0397338644 : f32
    %38 = vector.broadcast %cst_14 : f32 to vector<8x128xf32>
    %39 = arith.subf %20, %38 : vector<8x128xf32>
    %40 = arith.select %37, %33, %39 : vector<8x128xi1>, vector<8x128xf32>
    %c0_15 = arith.constant 0 : index
    %c0_16 = arith.constant 0 : index
    %41 = vector.load %arg6[%c0_15, %c0_16] : memref<8x1xi32, #tpu.memory_space<vmem>>, vector<8x1xi32>
    %42 = tpu.iota {dimensions = array<i32: 1>} : vector<8x128xi32>
    %43 = vector.broadcast %41 : vector<8x1xi32> to vector<8x128xi32>
    %44 = arith.cmpi eq, %42, %43 : vector<8x128xi32>
    %45 = arith.select %44, %40, %20 : vector<8x128xi1>, vector<8x128xf32>
    %cst_17 = arith.constant 3.000000e+01 : f32
    %46 = vector.broadcast %cst_17 : f32 to vector<8x128xf32>
    %47 = arith.mulf %45, %46 : vector<8x128xf32>
    %c64_i32 = arith.constant 64 : i32
    %48 = vector.broadcast %c64_i32 : i32 to vector<8x128xi32>
    %49 = arith.cmpi slt, %42, %48 : vector<8x128xi32>
    %cst_18 = arith.constant -1.000000e+30 : f32
    %50 = vector.broadcast %cst_18 : f32 to vector<8x128xf32>
    %51 = arith.select %49, %47, %50 : vector<8x128xi1>, vector<8x128xf32>
    %c0_19 = arith.constant 0 : index
    %c0_20 = arith.constant 0 : index
    %52 = vector.load %arg8[%c0_19, %c0_20] : memref<8x128xf32, #tpu.memory_space<vmem>>, vector<8x128xf32>
    tpu.vector_store %arg8[%c0_19, %c0_20], %51 {strides = array<i32>} : memref<8x128xf32, #tpu.memory_space<vmem>>, vector<8x128xf32>,
    %cst_21 = arith.constant dense<0xFF800000> : vector<8xf32>
    %53 = vector.multi_reduction <maximumf>, %51, %cst_21 [1] : vector<8x128xf32> to vector<8xf32>
    %54 = vector.shape_cast %53 : vector<8xf32> to vector<8x1xf32>
    %55 = vector.broadcast %54 : vector<8x1xf32> to vector<8x128xf32>
    %56 = arith.subf %51, %55 : vector<8x128xf32>
    %57 = math.exp %56 : vector<8x128xf32>
    %cst_22 = arith.constant dense<0.000000e+00> : vector<8xf32>
    %58 = vector.multi_reduction <add>, %57, %cst_22 [1] : vector<8x128xf32> to vector<8xf32>
    %59 = vector.shape_cast %58 : vector<8xf32> to vector<8x1xf32>
    %60 = math.log %59 : vector<8x1xf32>
    %61 = arith.addf %54, %60 : vector<8x1xf32>
    %cst_23 = arith.constant 0.000000e+00 : f32
    %62 = vector.broadcast %cst_23 : f32 to vector<8x128xf32>
    %63 = arith.select %44, %51, %62 : vector<8x128xi1>, vector<8x128xf32>
    %cst_24 = arith.constant dense<0.000000e+00> : vector<8xf32>
    %64 = vector.multi_reduction <add>, %63, %cst_24 [1] : vector<8x128xf32> to vector<8xf32>
    %65 = vector.shape_cast %64 : vector<8xf32> to vector<8x1xf32>
    %66 = arith.subf %61, %65 : vector<8x1xf32>
    %67 = arith.truncf %0 : vector<8x192xf32> to vector<8x192xbf16>
    %c0_25 = arith.constant 0 : index
    %c0_26 = arith.constant 0 : index
    %68 = vector.load %arg2[%c0_25, %c0_26] : memref<192x128xbf16, #tpu.memory_space<vmem>>, vector<192x128xbf16>
    %cst_27 = arith.constant dense<0.000000e+00> : vector<8x128xf32>
    %69 = tpu.matmul %67, %68, %cst_27 {dimension_numbers = #tpu.dot_dimension_numbers<[1], [0], [0], [1], [0, 0, 1, 1], [], []>} : vector<8x192xbf16>, vector<192x128xbf16>, vector<8x128xf32> -> vector<8x128xf32>
    %c0_28 = arith.constant 0 : index
    %c0_29 = arith.constant 0 : index
    %70 = vector.load %arg3[%c0_28, %c0_29] : memref<1x128xf32, #tpu.memory_space<vmem>>, vector<1x128xf32>
    %71 = vector.broadcast %70 : vector<1x128xf32> to vector<8x128xf32>
    %72 = arith.addf %69, %71 : vector<8x128xf32>
    %cst_30 = arith.constant 0.000000e+00 : f32
    %73 = vector.broadcast %cst_30 : f32 to vector<8x128xf32>
    %74 = arith.maximumf %72, %73 : vector<8x128xf32>
    %75 = arith.truncf %74 : vector<8x128xf32> to vector<8x128xbf16>
    %c0_31 = arith.constant 0 : index
    %c0_32 = arith.constant 0 : index
    %76 = vector.load %arg4[%c0_31, %c0_32] : memref<128x128xbf16, #tpu.memory_space<vmem>>, vector<128x128xbf16>
    %cst_33 = arith.constant dense<0.000000e+00> : vector<8x128xf32>
    %77 = tpu.matmul %75, %76, %cst_33 {dimension_numbers = #tpu.dot_dimension_numbers<[1], [0], [0], [1], [0, 0, 1, 1], [], []>} : vector<8x128xbf16>, vector<128x128xbf16>, vector<8x128xf32> -> vector<8x128xf32>
    %c0_34 = arith.constant 0 : index
    %c0_35 = arith.constant 0 : index
    %78 = vector.load %arg5[%c0_34, %c0_35] : memref<1x128xf32, #tpu.memory_space<vmem>>, vector<1x128xf32>
    %79 = vector.broadcast %78 : vector<1x128xf32> to vector<8x128xf32>
    %80 = arith.addf %77, %79 : vector<8x128xf32>
    %c0_36 = arith.constant 0 : index
    %c0_37 = arith.constant 0 : index
    %81 = vector.load %arg9[%c0_36, %c0_37] : memref<8x128xf32, #tpu.memory_space<vmem>>, vector<8x128xf32>
    tpu.vector_store %arg9[%c0_36, %c0_37], %80 {strides = array<i32>} : memref<8x128xf32, #tpu.memory_space<vmem>>, vector<8x128xf32>,
    %c0_38 = arith.constant 0 : index
    %c0_39 = arith.constant 0 : index
    %82 = vector.load %arg7[%c0_38, %c0_39] : memref<8x1xi32, #tpu.memory_space<vmem>>, vector<8x1xi32>
    %83 = tpu.iota {dimensions = array<i32: 1>} : vector<8x128xi32>
    %84 = vector.broadcast %82 : vector<8x1xi32> to vector<8x128xi32>
    %85 = arith.cmpi eq, %83, %84 : vector<8x128xi32>
    %c8_i32 = arith.constant 8 : i32
    %86 = vector.broadcast %c8_i32 : i32 to vector<8x128xi32>
    %87 = arith.cmpi slt, %83, %86 : vector<8x128xi32>
    %cst_40 = arith.constant -1.000000e+30 : f32
    %88 = vector.broadcast %cst_40 : f32 to vector<8x128xf32>
    %89 = arith.select %87, %80, %88 : vector<8x128xi1>, vector<8x128xf32>
    %cst_41 = arith.constant dense<0xFF800000> : vector<8xf32>
    %90 = vector.multi_reduction <maximumf>, %89, %cst_41 [1] : vector<8x128xf32> to vector<8xf32>
    %91 = vector.shape_cast %90 : vector<8xf32> to vector<8x1xf32>
    %92 = vector.broadcast %91 : vector<8x1xf32> to vector<8x128xf32>
    %93 = arith.subf %89, %92 : vector<8x128xf32>
    %94 = math.exp %93 : vector<8x128xf32>
    %cst_42 = arith.constant dense<0.000000e+00> : vector<8xf32>
    %95 = vector.multi_reduction <add>, %94, %cst_42 [1] : vector<8x128xf32> to vector<8xf32>
    %96 = vector.shape_cast %95 : vector<8xf32> to vector<8x1xf32>
    %97 = math.log %96 : vector<8x1xf32>
    %98 = arith.addf %91, %97 : vector<8x1xf32>
    %cst_43 = arith.constant 0.000000e+00 : f32
    %99 = vector.broadcast %cst_43 : f32 to vector<8x128xf32>
    %100 = arith.select %85, %89, %99 : vector<8x128xi1>, vector<8x128xf32>
    %cst_44 = arith.constant dense<0.000000e+00> : vector<8xf32>
    %101 = vector.multi_reduction <add>, %100, %cst_44 [1] : vector<8x128xf32> to vector<8xf32>
    %102 = vector.shape_cast %101 : vector<8xf32> to vector<8x1xf32>
    %103 = arith.subf %98, %102 : vector<8x1xf32>
    %cst_45 = arith.constant dense<0.000000e+00> : vector<1xf32>
    %104 = vector.multi_reduction <add>, %66, %cst_45 [0] : vector<8x1xf32> to vector<1xf32>
    %105 = vector.shape_cast %104 : vector<1xf32> to vector<1x1xf32>
    %cst_46 = arith.constant 1.250000e-01 : f32
    %106 = vector.broadcast %cst_46 : f32 to vector<1x1xf32>
    %107 = arith.mulf %105, %106 : vector<1x1xf32>
    %cst_47 = arith.constant dense<0.000000e+00> : vector<1xf32>
    %108 = vector.multi_reduction <add>, %103, %cst_47 [0] : vector<8x1xf32> to vector<1xf32>
    %109 = vector.shape_cast %108 : vector<1xf32> to vector<1x1xf32>
    %cst_48 = arith.constant 1.250000e-01 : f32
    %110 = vector.broadcast %cst_48 : f32 to vector<1x1xf32>
    %111 = arith.mulf %109, %110 : vector<1x1xf32>
    %cst_49 = arith.constant 1.000000e+00 : f32
    %112 = vector.broadcast %cst_49 : f32 to vector<1x1xf32>
    %113 = arith.mulf %112, %107 : vector<1x1xf32>
    %cst_50 = arith.constant 1.000000e+00 : f32
    %114 = vector.broadcast %cst_50 : f32 to vector<1x1xf32>
    %115 = arith.mulf %114, %111 : vector<1x1xf32>
    %116 = arith.addf %113, %115 : vector<1x1xf32>
    %117 = tpu.iota {dimensions = array<i32: 1>} : vector<1x128xi32>
    %c0_i32 = arith.constant 0 : i32
    %118 = vector.broadcast %c0_i32 : i32 to vector<1x128xi32>
    %119 = arith.cmpi eq, %117, %118 : vector<1x128xi32>
    %cst_51 = arith.constant 0.000000e+00 : f32
    %120 = vector.shape_cast %107 : vector<1x1xf32> to vector<1x1xf32>
    %121 = vector.broadcast %120 : vector<1x1xf32> to vector<1x128xf32>
    %122 = vector.broadcast %cst_51 : f32 to vector<1x128xf32>
    %123 = arith.select %119, %121, %122 : vector<1x128xi1>, vector<1x128xf32>
    %c1_i32 = arith.constant 1 : i32
    %124 = vector.broadcast %c1_i32 : i32 to vector<1x128xi32>
    %125 = arith.cmpi eq, %117, %124 : vector<1x128xi32>
    %cst_52 = arith.constant 0.000000e+00 : f32
    %126 = vector.shape_cast %111 : vector<1x1xf32> to vector<1x1xf32>
    %127 = vector.broadcast %126 : vector<1x1xf32> to vector<1x128xf32>
    %128 = vector.broadcast %cst_52 : f32 to vector<1x128xf32>
    %129 = arith.select %125, %127, %128 : vector<1x128xi1>, vector<1x128xf32>
    %130 = arith.addf %123, %129 : vector<1x128xf32>
    %c2_i32 = arith.constant 2 : i32
    %131 = vector.broadcast %c2_i32 : i32 to vector<1x128xi32>
    %132 = arith.cmpi eq, %117, %131 : vector<1x128xi32>
    %cst_53 = arith.constant 0.000000e+00 : f32
    %133 = vector.shape_cast %116 : vector<1x1xf32> to vector<1x1xf32>
    %134 = vector.broadcast %133 : vector<1x1xf32> to vector<1x128xf32>
    %135 = vector.broadcast %cst_53 : f32 to vector<1x128xf32>
    %136 = arith.select %132, %134, %135 : vector<1x128xi1>, vector<1x128xf32>
    %137 = arith.addf %130, %136 : vector<1x128xf32>
    %c0_54 = arith.constant 0 : index
    %c0_55 = arith.constant 0 : index
    %138 = vector.load %arg10[%c0_54, %c0_55] : memref<1x128xf32, #tpu.memory_space<vmem>>, vector<1x128xf32>
    tpu.vector_store %arg10[%c0_54, %c0_55], %137 {strides = array<i32>} : memref<1x128xf32, #tpu.memory_space<vmem>>, vector<1x128xf32>,
    return
  }
}

</mosaic_0001>

<bundles_post_ra>
// kernel: tpu_custom_call.1
= control target key start
LH: loop header
LB: loop body
LE: loop exit
PB: predicated region body
PF: predicated region fallthrough
CT: control target
= control target key end

     0   :  { %16 = vsyncpa [#allocation3], 0  ;;  %vm71_vm0 = vcmask 523264   ;;  %v916_v8 = vmov 0   ;;  %s1384_s0 = inlined_call_operand.vmem [shape: f32[8,192], index: 0, kind: input, shape index: {}]   ;;  %s1385_s1 = inlined_call_operand.vmem [shape: f32[128,192], index: 1, kind: input, shape index: {}]   ;;  %s1386_s2 = inlined_call_operand.vmem [shape: bf16[192,128], index: 2, kind: input, shape index: {}]   ;;  %s1387_s3 = inlined_call_operand.vmem [shape: f32[1,128], index: 3, kind: input, shape index: {}]   ;;  %s1388_s4 = inlined_call_operand.vmem [shape: bf16[128,128], index: 4, kind: input, shape index: {}]   ;;  %s1389_s5 = inlined_call_operand.vmem [shape: f32[1,128], index: 5, kind: input, shape index: {}]   ;;  %s1390_s6 = inlined_call_operand.vmem [shape: s32[8,1], index: 6, kind: input, shape index: {}]   ;;  %s1391_s7 = inlined_call_operand.vmem [shape: s32[8,1], index: 7, kind: input, shape index: {}]   ;;  %s1392_s8 = inlined_call_operand.hbm [shape: f32[8,128], index: 8, kind: output, shape index: {0}]   ;;  %s1393_s9 = inlined_call_operand.hbm [shape: f32[8,128], index: 9, kind: output, shape index: {1}]   ;;  %s1394_s10 = inlined_call_operand.hbm [shape: f32[1,128], index: 10, kind: output, shape index: {2}]  }
   0x1   :  { %v980_v0 = vld [vmem:[%s1385_s1 + $0xe0] sm:$0xff]  ;;  %v985_v1 = vld [vmem:[%s1385_s1 + $0xe8] sm:$0xff]  ;;  %v990_v2 = vld [vmem:[%s1385_s1 + $0xf0] sm:$0xff]  ;;  %477 = vmatprep.subr.bf16.mxu1 %v916_v8  ;;  %786 = vset.pattern.permute.xlu1 %v916_v8 }
   0x2   :  { %v108_v3 = vmul.f32 %v980_v0, %v980_v0  ;;  %v109_v4 = vmul.f32 %v985_v1, %v985_v1  ;;  %v999_v5 = vld [vmem:[%s1385_s1 + $0xf8] sm:$0xff]  ;;  %v1004_v6 = vld [vmem:[%s1385_s1 + $0xc0] sm:$0xff]  ;;  %v1009_v7 = vld [vmem:[%s1385_s1 + $0xc8] sm:$0xff]  ;;  %v110_v9 = vmul.f32 %v990_v2, %v990_v2  ;;  %787 = vset.pattern.permute.xlu0 %v916_v8 }
   0x3   :  { %v111_v10 = vmul.f32 %v999_v5, %v999_v5  ;;  %v104_v11 = vmul.f32 %v1004_v6, %v1004_v6  ;;  %v105_v12 = vmul.f32 %v1009_v7, %v1009_v7  ;;  %v1024_v13 = vld [vmem:[%s1385_s1 + $0xd0] sm:$0xff]  ;;  %v1029_v14 = vld [vmem:[%s1385_s1 + $0xd8] sm:$0xff]  ;;  %v1062_v29 = vld [vmem:[%s1385_s1 + $0xa0] sm:$0xff] }
   0x4   :  { %v168_v15 = vsel %vm71_vm0, %v109_v4, 0.0  ;;  %v106_v16 = vmul.f32 %v1024_v13, %v1024_v13  ;;  %v107_v17 = vmul.f32 %v1029_v14, %v1029_v14  ;;  %v788_v18 = vld [vmem:[%s1386_s2 + $0x38] sm:$0xff]   ;;  %v789_v22 = vld [vmem:[%s1386_s2 + $0x30] sm:$0xff]   ;;  %v1067_v30 = vld [vmem:[%s1385_s1 + $0xa8] sm:$0xff]  ;;  %v100_v33 = vmul.f32 %v1062_v29, %v1062_v29 }
   0x5   :  { %v169_v19 = vadd.f32 %v168_v15, %v108_v3  ;;  %v172_v20 = vsel %vm71_vm0, %v111_v10, 0.0  ;;  %v160_v21 = vsel %vm71_vm0, %v105_v12, 0.0  ;;  %478 = vmatpush1.bf16.msra.mxu1 %v788_v18  ;;  %v1049_v25 = vld [vmem:[%s1385_s1 + $0xb0] sm:$0xff]  ;;  %v1055_v27 = vld [vmem:[%s1385_s1 + $0xb8] sm:$0xff]  ;;  %v101_v34 = vmul.f32 %v1067_v30, %v1067_v30  ;;  %v790_v35 = vld [vmem:[%s1386_s2 + $0x28] sm:$0xff]  }
   0x6   :  { %v161_v23 = vadd.f32 %v160_v21, %v104_v11  ;;  %v164_v24 = vsel %vm71_vm0, %v107_v17, 0.0  ;;  %v173_v26 = vadd.f32 %v172_v20, %v110_v9  ;;  %479 = vmatprep.subr.bf16.mxu1 %v916_v8  ;;  %v102_v28 = vmul.f32 %v1049_v25, %v1049_v25  ;;  %v1083_v38 = vld [vmem:[%s1385_s1 + $0x90] sm:$0xff]  ;;  %v1088_v39 = vld [vmem:[%s1385_s1 + $0x98] sm:$0xff]  ;;  %v1093_v40 = vld [vmem:[%s1385_s1 + $0x80] sm:$0xff] }
   0x7   :  { %170 = vadd.xlane.f32.xlu0 %v169_v19  ;;  %v165_v31 = vadd.f32 %v164_v24, %v106_v16  ;;  %v103_v32 = vmul.f32 %v1055_v27, %v1055_v27  ;;  %v152_v37 = vsel %vm71_vm0, %v101_v34, 0.0  ;;  %v1099_v43 = vld [vmem:[%s1385_s1 + $0x88] sm:$0xff]  ;;  %v98_v44 = vmul.f32 %v1083_v38, %v1083_v38  ;;  %v791_v48 = vld [vmem:[%s1386_s2 + $0x20] sm:$0xff]   ;;  %v1115_v49 = vld [vmem:[%s1385_s1 + $0x70] sm:$0xff] }
   0x8   :  { %162 = vadd.xlane.f32.xlu1 %v161_v23  ;;  %v153_v42 = vadd.f32 %v152_v37, %v100_v33  ;;  %v99_v45 = vmul.f32 %v1088_v39, %v1088_v39  ;;  %v96_v46 = vmul.f32 %v1093_v40, %v1093_v40  ;;  %v97_v47 = vmul.f32 %v1099_v43, %v1099_v43  ;;  %v1120_v50 = vld [vmem:[%s1385_s1 + $0x78] sm:$0xff]  ;;  %v1129_v54 = vld [vmem:[%s1385_s1 + $0x60] sm:$0xff]  ;;  %v1134_v55 = vld [vmem:[%s1385_s1 + $0x68] sm:$0xff] }
   0x9   :  { %480 = vmatpush1.bf16.msra.mxu1 %v789_v22  ;;  %v156_v36 = vsel %vm71_vm0, %v103_v32, 0.0  ;;  %v95_v53 = vmul.f32 %v1120_v50, %v1120_v50  ;;  %v92_v57 = vmul.f32 %v1129_v54, %v1129_v54  ;;  %v94_v59 = vmul.f32 %v1115_v49, %v1115_v49  ;;  %v1146_v61 = vld [vmem:[%s1385_s1 + $0x50] sm:$0xff]  ;;  %v1152_v63 = vld [vmem:[%s1385_s1 + $0x58] sm:$0xff]  ;;  %v1157_v3 = vld [vmem:[%s1385_s1 + $0x40] sm:$0xff] }
   0xa   :  { %481 = vmatprep.subr.bf16.mxu1 %v916_v8  ;;  %v157_v41 = vadd.f32 %v156_v36, %v102_v28  ;;  %v148_v51 = vsel %vm71_vm0, %v99_v45, 0.0  ;;  %v144_v52 = vsel %vm71_vm0, %v97_v47, 0.0  ;;  %v93_v60 = vmul.f32 %v1134_v55, %v1134_v55  ;;  %v1162_v4 = vld [vmem:[%s1385_s1 + $0x48] sm:$0xff]  ;;  %v792_v9 = vld [vmem:[%s1386_s2 + $0x18] sm:$0xff]   ;;  %v1181_v20 = vld [vmem:[%s1385_s1 + $0x30] sm:$0xff] }
   0xb   :  { %174 = vadd.xlane.f32.xlu0 %v173_v26  ;;  %v145_v56 = vadd.f32 %v144_v52, %v96_v46  ;;  %v149_v58 = vadd.f32 %v148_v51, %v98_v44  ;;  %v140_v62 = vsel %vm71_vm0, %v95_v53, 0.0  ;;  %v91_v11 = vmul.f32 %v1152_v63, %v1152_v63  ;;  %v1186_v21 = vld [vmem:[%s1385_s1 + $0x38] sm:$0xff]  ;;  %v1191_v22 = vld [vmem:[%s1385_s1 + $0x20] sm:$0xff]  ;;  %v1199_v26 = vld [vmem:[%s1385_s1 + $0x28] sm:$0xff] }
   0xc   :  { %166 = vadd.xlane.f32.xlu1 %v165_v31  ;;  %v136_v10 = vsel %vm71_vm0, %v93_v60, 0.0  ;;  %v89_v12 = vmul.f32 %v1162_v4, %v1162_v4  ;;  %v88_v16 = vmul.f32 %v1157_v3, %v1157_v3  ;;  %v141_v17 = vadd.f32 %v140_v62, %v94_v59  ;;  %v793_v28 = vld [vmem:[%s1386_s2 + $0x10] sm:$0xff]   ;;  %v1209_v32 = vld [vmem:[%s1384_s0 + $0x8] sm:$0xff]  ;;  %v795_v59 = vld [vmem:[%s1386_s2] sm:$0xff]  }
   0xd   :  { %482 = vmatpush1.bf16.msra.mxu1 %v790_v35  ;;  %v137_v15 = vadd.f32 %v136_v10, %v92_v57  ;;  %v90_v18 = vmul.f32 %v1146_v61, %v1146_v61  ;;  %v132_v23 = vsel %vm71_vm0, %v91_v11, 0.0  ;;  %v87_v24 = vmul.f32 %v1186_v21, %v1186_v21  ;;  %v1220_v37 = vld [vmem:[%s1385_s1 + $0x10] sm:$0xff]  ;;  %v794_v52 = vld [vmem:[%s1386_s2 + $0x8] sm:$0xff]   ;;  %v1263_v10 = vld [vmem:[%s1384_s0] sm:$0xff] }
   0xe   :  { %483 = vmatprep.subr.bf16.mxu1 %v916_v8  ;;  %v128_v19 = vsel %vm71_vm0, %v89_v12, 0.0  ;;  %v85_v31 = vmul.f32 %v1199_v26, %v1199_v26  ;;  %v84_v35 = vmul.f32 %v1191_v22, %v1191_v22  ;;  %v370_v36 = vpack.c.bf16 %v1209_v32, %v1209_v32 }
   0xf   :  { %154 = vadd.xlane.f32.xlu0 %v153_v42  ;;  %v129_v33 = vadd.f32 %v128_v19, %v88_v16  ;;  %v124_v34 = vsel %vm71_vm0, %v87_v24, 0.0  ;;  %v1230_v42 = vld [vmem:[%s1385_s1] sm:$0xff]  ;;  %v133_v44 = vadd.f32 %v132_v23, %v90_v18  ;;  %v86_v45 = vmul.f32 %v1181_v20, %v1181_v20 }
  0x10   :  { %158 = vadd.xlane.f32.xlu1 %v157_v41  ;;  %v1225_v41 = vld [vmem:[%s1385_s1 + $0x18] sm:$0xff]  ;;  %v120_v46 = vsel %vm71_vm0, %v85_v31, 0.0  ;;  %741 = vmatprep.mubr.msk.bf16.mxu1 %vm71_vm0, %v370_v36  ;;  %v80_v57 = vmul.f32 %v1230_v42, %v1230_v42  ;;  %v82_v62 = vmul.f32 %v1220_v37, %v1220_v37 }
  0x11   :  { %484 = vmatpush1.bf16.msra.mxu1 %v791_v48  ;;  %v83_v47 = vmul.f32 %v1225_v41, %v1225_v41  ;;  %v1240_v48 = vld [vmem:[%s1385_s1 + $0x8] sm:$0xff]  ;;  %v121_v53 = vadd.f32 %v120_v46, %v84_v35  ;;  %v125_v60 = vadd.f32 %v124_v34, %v86_v45 }
  0x12   :  { %485 = vmatprep.subr.bf16.mxu1 %v916_v8  ;;  %v81_v51 = vmul.f32 %v1240_v48, %v1240_v48 }
  0x13   :  { %146 = vadd.xlane.f32.xlu0 %v145_v56  ;;  %v116_v56 = vsel %vm71_vm0, %v83_v47, 0.0 }
  0x14   :  { %150 = vadd.xlane.f32.xlu1 %v149_v58  ;;  %v112_v58 = vsel %vm71_vm0, %v81_v51, 0.0 }
  0x15   :  { %486 = vmatpush1.bf16.msra.mxu1 %v792_v9  ;;  %v70_v9 = vmul.f32 %v1209_v32, %v1209_v32 }
  0x16   :  { %487 = vmatprep.subr.bf16.mxu1 %v916_v8 }
  0x17   :  { %138 = vadd.xlane.f32.xlu0 %v137_v15 }
  0x18   :  { %142 = vadd.xlane.f32.xlu1 %v141_v17 }
  0x19   :  { %488 = vmatpush1.bf16.msra.mxu1 %v793_v28 }
  0x1a   :  { %489 = vmatprep.subr.bf16.mxu1 %v916_v8 }
  0x1b   :  { %130 = vadd.xlane.f32.xlu0 %v129_v33 }
  0x1c   :  { %134 = vadd.xlane.f32.xlu1 %v133_v44 }
  0x1d   :  { %490 = vmatpush1.bf16.msra.mxu1 %v794_v52 }
  0x1e   :  { %17 = vsyncpa [#allocation5], 0  ;;  %491 = vmatprep.subr.bf16.mxu1 %v916_v8  ;;  %v113_v11 = vadd.f32 %v112_v58, %v80_v57  ;;  %v69_v12 = vmul.f32 %v1263_v10, %v1263_v10  ;;  %v117_v15 = vadd.f32 %v116_v56, %v82_v62  ;;  %v72_v16 = vsel %vm71_vm0, %v70_v9, 0.0  ;;  %v796_v17 = vld [vmem:[%s1386_s2 + $0x58] sm:$0xff]   ;;  %v797_v19 = vld [vmem:[%s1386_s2 + $0x50] sm:$0xff]   ;;  %s920_s21 = smov [#allocation2]  }
  0x1f   :  { %122 = vadd.xlane.f32.xlu0 %v121_v53  ;;  %v798_v23 = vld [vmem:[%s1386_s2 + $0x48] sm:$0xff]   ;;  %v799_v24 = vld [vmem:[%s1386_s2 + $0x40] sm:$0xff]   ;;  %v369_v28 = vpack.c.bf16 %v1263_v10, %v1263_v10  ;;  %v800_v31 = vld [vmem:[%s1388_s4 + $0x38] sm:$0xff]   ;;  %v917_v33 = vmov 0.0   ;;  %vm918_vm1 = vmmov 0   ;;  %s682_s22 = sshll.u32 %s920_s21, 4  ;;  %s683_s22 = int_to_ptr.vmem [resolvable:$true] %s682_s22 }
  0x20   :  { %126 = vadd.xlane.f32.xlu1 %v125_v60  ;;  %v73_v18 = vadd.f32 %v72_v16, %v69_v12  ;;  %v801_v34 = vld [vmem:[%s1388_s4 + $0x30] sm:$0xff]   ;;  %v803_v35 = vld [vmem:[%s1388_s4 + $0x20] sm:$0xff]   ;;  %v804_v36 = vld [vmem:[%s1388_s4 + $0x18] sm:$0xff]  }
  0x21   :  { %492 = vmatpush1.bf16.msra.mxu1 %v795_v59  ;;  %v805_v44 = vld [vmem:[%s1388_s4 + $0x10] sm:$0xff]   ;;  %v806_v45 = vld [vmem:[%s1388_s4 + $0x8] sm:$0xff]   ;;  %v343_v46 = vld [vmem:[%s1390_s6] sm:$0xff] }
  0x22   :  { %501 = vmatprep.subr.bf16.mxu1 %v916_v8  ;;  %v807_v47 = vld [vmem:[%s1388_s4] sm:$0xff]  }
  0x23   :  { %114 = vadd.xlane.f32.xlu0 %v113_v11 }
  0x24   :  { %118 = vadd.xlane.f32.xlu1 %v117_v15 }
  0x25   :  { %502 = vmatpush2.bf16.msra.mxu1 %v796_v17 }
  0x26   :  { %503 = vmatprep.subr.bf16.mxu1 %v916_v8 }
  0x27   :  { %74 = vadd.xlane.f32.xlu0 %v73_v18 }
  0x29   :  { %504 = vmatpush2.bf16.msra.mxu1 %v797_v19 }
  0x2a   :  { %505 = vmatprep.subr.bf16.mxu1 %v916_v8 }
  0x2d   :  { %506 = vmatpush2.bf16.msra.mxu1 %v798_v23 }
  0x2e   :  { %507 = vmatprep.subr.bf16.mxu1 %v916_v8  ;;  %v802_v8 = vld [vmem:[%s1388_s4 + $0x28] sm:$0xff]  }
  0x31   :  { %508 = vmatpush2.bf16.msra.mxu1 %v799_v24 }
  0x32   :  { %760 = vmatprep.subr.bf16.mxu1 %v917_v33 }
  0x34   :  { %510 = vmatmul.mubr.bf16.vlgmr.msra.gmra.mxu1 %v369_v28 }
  0x35   :  { %761 = vmatpush3.bf16.msra.mxu1 %v800_v31  ;;  %776 = vmatprep.mubr.msk.bf16.mxu1 %vm918_vm1, %v917_v33 }
  0x36   :  { %762 = vmatprep.subr.bf16.mxu1 %v917_v33  ;;  %347 = vperm.xlu1 %786, %v343_v46  }
  0x39   :  { %763 = vmatpush3.bf16.msra.mxu1 %v801_v34 }
  0x3a   :  { %764 = vmatprep.subr.bf16.mxu1 %v917_v33 }
  0x3d   :  { %765 = vmatpush3.bf16.msra.mxu1 %v802_v8 }
  0x3e   :  { %766 = vmatprep.subr.bf16.mxu1 %v917_v33 }
  0x41   :  { %767 = vmatpush3.bf16.msra.mxu1 %v803_v35 }
  0x42   :  { %768 = vmatprep.subr.bf16.mxu1 %v917_v33 }
  0x45   :  { %769 = vmatpush3.bf16.msra.mxu1 %v804_v36 }
  0x46   :  { %770 = vmatprep.subr.bf16.mxu1 %v917_v33 }
  0x49   :  { %771 = vmatpush3.bf16.msra.mxu1 %v805_v44 }
  0x4a   :  { %772 = vmatprep.subr.bf16.mxu1 %v917_v33 }
  0x4d   :  { %773 = vmatpush3.bf16.msra.mxu1 %v806_v45 }
  0x4e   :  { %774 = vmatprep.subr.bf16.mxu1 %v917_v33 }
  0x51   :  { %775 = vmatpush3.bf16.msra.mxu1 %v807_v47 }
  0x90   :  { %v171_v51 = vpop.xlane.xlu0 %170 }
  0x91   :  { %v190_v52 = vmax.f32 %v171_v51, 1e-24  ;;  %v163_v53 = vpop.xlane.xlu1 %162 }
  0x92   :  { %v188_v56 = vmax.f32 %v163_v53, 1e-24 }
  0x94   :  { %v175_v57 = vpop.xlane.xlu0 %174  ;;  %808 = vrsqrt.f32 %v188_v56 }
  0x95   :  { %810 = vrsqrt.f32 %v190_v52  ;;  %v191_v58 = vmax.f32 %v175_v57, 1e-24  ;;  %v167_v59 = vpop.xlane.xlu1 %166 }
  0x96   :  { %v189_v60 = vmax.f32 %v167_v59, 1e-24 }
  0x97   :  { %812 = vrsqrt.f32 %v191_v58 }
  0x98   :  { %814 = vrsqrt.f32 %v189_v60  ;;  %v155_v62 = vpop.xlane.xlu0 %154 }
  0x99   :  { %v159_v9 = vpop.xlane.xlu1 %158  ;;  %v186_v11 = vmax.f32 %v155_v62, 1e-24 }
  0x9a   :  { %v187_v12 = vmax.f32 %v159_v9, 1e-24 }
  0x9b   :  { %816 = vrsqrt.f32 %v186_v11 }
  0x9c   :  { %818 = vrsqrt.f32 %v187_v12  ;;  %v147_v15 = vpop.xlane.xlu0 %146 }
  0x9d   :  { %v151_v16 = vpop.xlane.xlu1 %150  ;;  %v184_v17 = vmax.f32 %v147_v15, 1e-24 }
  0x9e   :  { %v185_v18 = vmax.f32 %v151_v16, 1e-24 }
  0x9f   :  { %820 = vrsqrt.f32 %v184_v17 }
  0xa0   :  { %v139_v19 = vpop.xlane.xlu0 %138  ;;  %822 = vrsqrt.f32 %v185_v18 }
  0xa1   :  { %v809_v23 = vpop.eup %808  ;;  %v143_v33 = vpop.xlane.xlu1 %142  ;;  %v182_v47 = vmax.f32 %v139_v19, 1e-24 }
  0xa2   :  { %v811_v24 = vpop.eup %810  ;;  %v233_v31 = vmul.f32 %v809_v23, %v1009_v7  ;;  %v183_v53 = vmax.f32 %v143_v33, 1e-24 }
  0xa3   :  { %v237_v35 = vmul.f32 %v811_v24, %v985_v1  ;;  %v236_v44 = vmul.f32 %v811_v24, %v980_v0  ;;  %824 = vrsqrt.f32 %v182_v47 }
  0xa4   :  { %v813_v28 = vpop.eup %812  ;;  %v131_v34 = vpop.xlane.xlu0 %130  ;;  %826 = vrsqrt.f32 %v183_v53 }
  0xa5   :  { %v815_v8 = vpop.eup %814  ;;  %v239_v36 = vmul.f32 %v813_v28, %v999_v5  ;;  %v238_v45 = vmul.f32 %v813_v28, %v990_v2  ;;  %v135_v2 = vpop.xlane.xlu1 %134  ;;  %v232_v5 = vmul.f32 %v809_v23, %v1004_v6  ;;  %v180_v60 = vmax.f32 %v131_v34, 1e-24 }
  0xa6   :  { %v235_v46 = vmul.f32 %v815_v8, %v1029_v14  ;;  %v234_v14 = vmul.f32 %v815_v8, %v1024_v13  ;;  %v181_v62 = vmax.f32 %v135_v2, 1e-24 }
  0xa7   :  { %v257_v51 = vpack.c.bf16 %v239_v36, %v237_v35  ;;  %v256_v52 = vpack.c.bf16 %v238_v45, %v236_v44  ;;  %828 = vrsqrt.f32 %v180_v60 }
  0xa8   :  { %v817_v56 = vpop.eup %816  ;;  %v255_v57 = vpack.c.bf16 %v235_v46, %v233_v31  ;;  %v123_v7 = vpop.xlane.xlu0 %122  ;;  %v254_v15 = vpack.c.bf16 %v234_v14, %v232_v5  ;;  %830 = vrsqrt.f32 %v181_v62 }
  0xa9   :  { %v819_v58 = vpop.eup %818  ;;  %717 = vmatprep.subr.msk.bf16.mxu0 %vm71_vm0, %v257_v51  ;;  %v229_v0 = vmul.f32 %v817_v56, %v1067_v30  ;;  %v228_v30 = vmul.f32 %v817_v56, %v1062_v29  ;;  %v127_v18 = vpop.xlane.xlu1 %126  ;;  %v178_v23 = vmax.f32 %v123_v7, 1e-24 }
  0xaa   :  { %286 = vmatpush1.bf16.xpose.msra.mxu0 %v256_v52  ;;  %v231_v1 = vmul.f32 %v819_v58, %v1055_v27  ;;  %v230_v27 = vmul.f32 %v819_v58, %v1049_v25  ;;  %v179_v31 = vmax.f32 %v127_v18, 1e-24  ;;  %v742_v18 = vld [vmem:[%s1389_s5] ss:$0 sm:$0xff] }
  0xab   :  { %718 = vmatprep.subr.msk.bf16.mxu0 %vm71_vm0, %v255_v57 }
  0xac   :  { %v115_v59 = vpop.xlane.xlu0 %114  ;;  %v821_v9 = vpop.eup %820  ;;  %v253_v11 = vpack.c.bf16 %v231_v1, %v229_v0  ;;  %v252_v19 = vpack.c.bf16 %v230_v27, %v228_v30 }
  0xad   :  { %v823_v12 = vpop.eup %822  ;;  %v225_v6 = vmul.f32 %v821_v9, %v1099_v43  ;;  %v224_v29 = vmul.f32 %v821_v9, %v1093_v40  ;;  %v119_v34 = vpop.xlane.xlu1 %118  ;;  %v176_v36 = vmax.f32 %v115_v59, 1e-24 }
  0xae   :  { %v227_v13 = vmul.f32 %v823_v12, %v1088_v39  ;;  %v226_v25 = vmul.f32 %v823_v12, %v1083_v38  ;;  %v177_v46 = vmax.f32 %v119_v34, 1e-24 }
  0xb0   :  { %v75_v16 = vpop.xlane.xlu0 %74  ;;  %v825_v24 = vpop.eup %824  ;;  %v251_v28 = vpack.c.bf16 %v227_v13, %v225_v6  ;;  %v250_v35 = vpack.c.bf16 %v226_v25, %v224_v29 }
  0xb1   :  { %v76_v17 = vmax.f32 %v75_v16, 1e-24  ;;  %v827_v33 = vpop.eup %826  ;;  %v221_v43 = vmul.f32 %v825_v24, %v1134_v55  ;;  %v220_v38 = vmul.f32 %v825_v24, %v1129_v54  ;;  %v344_v24 = vlaneseq }
  0xb2   :  { %288 = vmatpush1.bf16.xpose.msra.mxu0 %v254_v15  ;;  %v223_v39 = vmul.f32 %v827_v33, %v1120_v50  ;;  %v222_v51 = vmul.f32 %v827_v33, %v1115_v49 }
  0xb3   :  { %719 = vmatprep.subr.msk.bf16.mxu0 %vm71_vm0, %v253_v11  ;;  %832 = vrsqrt.f32 %v76_v17 }
  0xb4   :  { %834 = vrsqrt.f32 %v178_v23  ;;  %v829_v8 = vpop.eup %828  ;;  %v249_v45 = vpack.c.bf16 %v223_v39, %v221_v43  ;;  %v248_v53 = vpack.c.bf16 %v222_v51, %v220_v38  ;;  %v1363_v43 = vand.u32 127, %v344_v24 }
  0xb5   :  { %836 = vrsqrt.f32 %v179_v31  ;;  %v831_v44 = vpop.eup %830  ;;  %v217_v50 = vmul.f32 %v829_v8, %v1162_v4  ;;  %v216_v54 = vmul.f32 %v829_v8, %v1157_v3  ;;  %v348_v8 = vpop.permute.xlu1 %347 }
  0xb6   :  { %838 = vrsqrt.f32 %v176_v36  ;;  %v219_v55 = vmul.f32 %v831_v44, %v1152_v63  ;;  %v218_v49 = vmul.f32 %v831_v44, %v1146_v61  ;;  %vm349_vm4 = vcmp.eq.s32.totalorder %v1363_v43, %v348_v8 }
  0xb7   :  { %840 = vrsqrt.f32 %v177_v46  ;;  %vm352_vm6 = vcmp.lt.s32.totalorder %v1363_v43, 64  ;;  %vm636_vm7 = vcmp.lt.s32.totalorder %v1363_v43, 8 }
  0xb8   :  { %v247_v57 = vpack.c.bf16 %v219_v55, %v217_v50  ;;  %v246_v58 = vpack.c.bf16 %v218_v49, %v216_v54 }
  0xba   :  { %290 = vmatpush1.bf16.xpose.msra.mxu0 %v252_v19 }
  0xbb   :  { %720 = vmatprep.subr.msk.bf16.mxu0 %vm71_vm0, %v251_v28 }
  0xc0   :  { %v833_v47 = vpop.eup %832 }
  0xc1   :  { %v79_v40 = vmul.f32 %v833_v47, %v1209_v32  ;;  %v835_v56 = vpop.eup %834 }
  0xc2   :  { %292 = vmatpush1.bf16.xpose.msra.mxu0 %v250_v35  ;;  %v837_v32 = vpop.eup %836  ;;  %v213_v7 = vmul.f32 %v835_v56, %v1199_v26  ;;  %v212_v2 = vmul.f32 %v835_v56, %v1191_v22  ;;  %v78_v22 = vmul.f32 %v833_v47, %v1263_v10 }
  0xc3   :  { %721 = vmatprep.subr.msk.bf16.mxu0 %vm71_vm0, %v249_v45  ;;  %v241_v52 = vpack.c.bf16 %v79_v40, %v79_v40  ;;  %v215_v4 = vmul.f32 %v837_v32, %v1186_v21  ;;  %v839_v63 = vpop.eup %838  ;;  %v214_v5 = vmul.f32 %v837_v32, %v1181_v20 }
  0xc4   :  { %v841_v1 = vpop.eup %840  ;;  %v209_v3 = vmul.f32 %v839_v63, %v1240_v48  ;;  %v208_v21 = vmul.f32 %v839_v63, %v1230_v42  ;;  %v240_v20 = vpack.c.bf16 %v78_v22, %v78_v22  ;;  %v728_v48 = vld [vmem:[%s1387_s3] ss:$0 sm:$0xff] }
  0xc5   :  { %725 = vmatprep.mubr.msk.bf16.mxu0 %vm71_vm0, %v241_v52  ;;  %v245_v0 = vpack.c.bf16 %v215_v4, %v213_v7  ;;  %v211_v61 = vmul.f32 %v841_v1, %v1225_v41  ;;  %v244_v14 = vpack.c.bf16 %v214_v5, %v212_v2  ;;  %v210_v26 = vmul.f32 %v841_v1, %v1220_v37  ;;  %v631_v52 = vld [vmem:[%s1391_s7] sm:$0xff]  ;;  %s919_s7 = smov [#allocation4]  }
  0xc6   :  { %s692_s20 = sshll.u32 %s919_s7, 4  ;;  %s693_s20 = int_to_ptr.vmem [resolvable:$true] %s692_s20 }
  0xc7   :  { %v243_v59 = vpack.c.bf16 %v211_v61, %v209_v3  ;;  %v242_v60 = vpack.c.bf16 %v210_v26, %v208_v21  ;;  %s852_s23 = scalar_lea.vmem %s693_s20, 128  ;;  %p857_p1 = scmp.lt.s32.totalorder %s693_s20, %s693_s20 }
  0xc8   :  { %p853_p0 = scmp.ne.s32.totalorder %s693_s20, %s852_s23  ;;  %p858_p2 = scmp.lt.s32.totalorder %s852_s23, %s852_s23 }
  0xca   :  { %294 = vmatpush1.bf16.xpose.msra.mxu0 %v248_v53  ;;  %p859_p3 = por %p858_p2, %p857_p1 }
  0xcb   :  { %722 = vmatprep.subr.msk.bf16.mxu0 %vm71_vm0, %v247_v57 }
  0xcc   :  { %p860_p4 = pnand %p859_p3, %p853_p0 }
  0xd2   :  { %296 = vmatpush1.bf16.xpose.msra.mxu0 %v246_v58 }
  0xd3   :  { %723 = vmatprep.subr.msk.bf16.mxu0 %vm71_vm0, %v245_v0 }
  0xda   :  { %298 = vmatpush1.bf16.xpose.msra.mxu0 %v244_v14 }
  0xdb   :  { %724 = vmatprep.subr.msk.bf16.mxu0 %vm71_vm0, %v243_v59 }
  0xe2   :  { %300 = vmatpush1.bf16.xpose.msra.mxu0 %v242_v60 }
  0xe9   :  { %318 = vmatmul.mubr.bf16.vlgmr.msra.gmra.mxu0 %v240_v20 }
  0xf4   :  { %v511_v41 = vpop.f32.mrf.mxu1 }
  0xf5   :  { %v512_v62 = vadd.f32 %v728_v48, %v511_v41 }
  0xf6   :  { %v513_v9 = vpop.f32.mrf.mxu1 }
  0xf7   :  { %v517_v11 = vmax.f32 %v512_v62, 0.0 }
  0xf8   :  { %v514_v12 = vpop.f32.mrf.mxu1 }
  0xf9   :  { %v518_v42 = vpack.c.bf16 %v517_v11, %v517_v11 }
  0xfa   :  { %v515_v15 = vpop.f32.mrf.mxu1 }
  0xfb   :  { %777 = vmatmul.mubr.bf16.vlgmr.msra.gmra.mxu1 %v518_v42 }
 0x1a9   :  { %v319_v37 = vpop.f32.mrf.mxu0 }
 0x1aa   :  { %v325_v16 = vmul.f32 %v319_v37, %v319_v37  ;;  %v726_v36 = vadd.f32 0.9800666, %v319_v37  ;;  %v336_v44 = vmul.f32 0.9800666, %v319_v37  ;;  %v727_v46 = vadd.f32 -0.039733864, %v319_v37 }
 0x1ab   :  { %v321_v17 = vpop.f32.mrf.mxu0 }
 0x1ac   :  { %v326_v30 = vsub.f32 1.0, %v325_v16  ;;  %vm340_vm5 = vcmp.gt.f32.partialorder %v726_v36, 0.0 }
 0x1ad   :  { %v322_v10 = vpop.f32.mrf.mxu0 }
 0x1ae   :  { %v327_v27 = vmax.f32 %v326_v30, 0.0 }
 0x1af   :  { %v323_v6 = vpop.f32.mrf.mxu0 }
 0x1b0   :  { %v328_v13 = vmin.f32 %v327_v27, 1.0 }
 0x1b2   :  { %842 = vrsqrt.f32 %v328_v13  ;;  %vm331_vm2 = vcmp.eq.f32.partialorder %v328_v13, inf  ;;  %v334_v25 = vand.u32 2147483648, %v328_v13  ;;  %vm333_vm3 = vcmp.eq.f32.partialorder %v328_v13, 0.0 }
 0x1bb   :  { %v624_v19 = vpop.f32.mrf.mxu1 }
 0x1bc   :  { %v625_v23 = vadd.f32 %v742_v18, %v624_v19 }
 0x1bd   :  { %v778_v28 = vpop.f32.mrf.mxu1 }
 0x1be   :  { %630 = vst [vmem:[#allocation4] sm:$0xff] %v625_v23  ;;  %v637_v55 = vsel %vm636_vm7, %v625_v23, -1e+30 }
 0x1bf   :  { %v843_v31 = vpop.eup %842  ;;  %v627_v29 = vpop.f32.mrf.mxu1 }
 0x1c0   :  { %v330_v33 = vmul.f32 %v843_v31, %v328_v13 }
 0x1c1   :  { %v779_v34 = vpop.f32.mrf.mxu1 }
 0x1c2   :  { %v332_v39 = vsel %vm331_vm2, %v328_v13, %v330_v33 }
 0x1c3   :  { %v335_v35 = vsel %vm333_vm3, %v334_v25, %v332_v39 }
 0x1c4   :  { %v337_v45 = vmul.f32 0.19866933, %v335_v35 }
 0x1c6   :  { %v338_v47 = vsub.f32 %v336_v44, %v337_v45 }
 0x1c8   :  { %v342_v40 = vsel %vm340_vm5, %v338_v47, %v727_v46 }
 0x1c9   :  { %v350_v38 = vsel %vm349_vm4, %v342_v40, %v319_v37 }
 0x1ca   :  { %v351_v51 = vmul.f32 30.0, %v350_v38 }
 0x1cc   :  { %v353_v50 = vsel %vm352_vm6, %v351_v51, -1e+30 }
 0x1cd   :  { %355 = vmax.xlane.f32.xlu0 %v353_v50  ;;  %354 = vst [vmem:[#allocation2] sm:$0xff] %v353_v50  ;;  %v365_v53 = vsel %vm349_vm4, %v353_v50, 0.0 }
 0x1d1   :  { %638 = vmax.xlane.f32.xlu0 %v637_v55 }
 0x1e7   :  { %633 = vperm.xlu0 %787, %v631_v52  }
 0x206   :  { %366 = vadd.xlane.f32.xlu0 %v365_v53 }
 0x256   :  { %v356_v56 = vpop.xlane.xlu0 %355 }
 0x257   :  { %v357_v57 = vsub.f32 %v353_v50, %v356_v56 }
 0x259   :  { %v358_v32 = vmul.f32 1.442695, %v357_v57 }
 0x25a   :  { %v639_v54 = vpop.xlane.xlu0 %638 }
 0x25b   :  { %844 = vpow2.f32 %v358_v32  ;;  %v640_v49 = vsub.f32 %v637_v55, %v639_v54 }
 0x25d   :  { %v641_v7 = vmul.f32 1.442695, %v640_v49 }
 0x25f   :  { %846 = vpow2.f32 %v641_v7 }
 0x262   :  { %v634_v58 = vpop.permute.xlu0 %633 }
 0x263   :  { %vm635_vm8 = vcmp.eq.s32.totalorder %v1363_v43, %v634_v58 }
 0x264   :  { %v648_v0 = vsel %vm635_vm8, %v637_v55, 0.0 }
 0x268   :  { %v845_v4 = vpop.eup %844 }
 0x269   :  { %360 = vadd.xlane.f32.xlu1 %v845_v4 }
 0x26c   :  { %v847_v63 = vpop.eup %846 }
 0x26d   :  { %643 = vadd.xlane.f32.xlu1 %v847_v63 }
 0x271   :  { %649 = vadd.xlane.f32.xlu1 %v648_v0 }
 0x272   :  { %863 = shalt.err (!%p860_p4)
}
 0x273   :  { %695 = dma.vmem_to_hbm [thread:$0]  %s693_s20, 128, %s1393_s9, [#allocation5]  }
 0x274   :  { %s872_s26 = scalar_lea.vmem %s683_s22, 128  ;;  %p877_p6 = scmp.lt.s32.totalorder %s683_s22, %s683_s22 }
 0x275   :  { %p873_p5 = scmp.ne.s32.totalorder %s683_s22, %s872_s26  ;;  %p878_p7 = scmp.lt.s32.totalorder %s872_s26, %s872_s26 }
 0x277   :  { %p879_p8 = por %p878_p7, %p877_p6 }
 0x279   :  { %p880_p9 = pnand %p879_p8, %p873_p5 }
 0x27b   :  { %883 = shalt.err (!%p880_p9)
}
 0x27c   :  { %685 = dma.vmem_to_hbm [thread:$0]  %s683_s22, 128, %s1392_s8, [#allocation3]   ;;  %vm667_vm9 = vcmp.eq.s32.totalorder %v1363_v43, 0  ;;  %vm669_vm10 = vcmp.eq.s32.totalorder %v1363_v43, 1  ;;  %vm672_vm11 = vcmp.eq.s32.totalorder %v1363_v43, 2 }
 0x27d   :  { %s921_s8 = smov [#allocation6]  }
 0x27e   :  { %s702_s9 = sshll.u32 %s921_s8, 4  ;;  %s703_s9 = int_to_ptr.vmem [resolvable:$true] %s702_s9 }
 0x27f   :  { %s892_s28 = scalar_lea.vmem %s703_s9, 16  ;;  %s896_s29 = scalar_lea.vmem %s703_s9, 32 }
 0x280   :  { %p893_p10 = scmp.ne.s32.totalorder %s703_s9, %s892_s28  ;;  %p897_p11 = scmp.lt.s32.totalorder %s703_s9, %s703_s9 }
 0x281   :  { %p898_p12 = scmp.lt.s32.totalorder %s896_s29, %s892_s28 }
 0x283   :  { %p899_p13 = por %p898_p12, %p897_p11 }
 0x285   :  { %p900_p0 = pnand %p899_p13, %p893_p10 }
 0x28f   :  { %v367_v59 = vpop.xlane.xlu0 %366 }
 0x2f2   :  { %v361_v1 = vpop.xlane.xlu1 %360 }
 0x2f3   :  { %848 = vlog2.f32 %v361_v1 }
 0x2f6   :  { %v644_v2 = vpop.xlane.xlu1 %643 }
 0x2f7   :  { %850 = vlog2.f32 %v644_v2 }
 0x2fa   :  { %v650_v20 = vpop.xlane.xlu1 %649 }
 0x300   :  { %v849_v5 = vpop.eup %848 }
 0x301   :  { %v363_v3 = vmul.f32 0.6931472, %v849_v5 }
 0x303   :  { %v364_v61 = vadd.f32 %v363_v3, %v356_v56 }
 0x304   :  { %v851_v14 = vpop.eup %850 }
 0x305   :  { %v368_v21 = vsub.f32 %v364_v61, %v367_v59  ;;  %v646_v26 = vmul.f32 0.6931472, %v851_v14 }
 0x307   :  { %v652_v60 = vrot.slane %v368_v21, 4  ;;  %v647_v22 = vadd.f32 %v646_v26, %v639_v54 }
 0x309   :  { %v653_v48 = vadd.f32 %v652_v60, %v368_v21  ;;  %v651_v41 = vsub.f32 %v647_v22, %v650_v20 }
 0x30b   :  { %v659_v62 = vrot.slane %v651_v41, 4  ;;  %v654_v9 = vrot.slane %v653_v48, 2 }
 0x30d   :  { %v660_v11 = vadd.f32 %v659_v62, %v651_v41  ;;  %v655_v12 = vadd.f32 %v654_v9, %v653_v48 }
 0x30f   :  { %v661_v42 = vrot.slane %v660_v11, 2  ;;  %v656_v15 = vrot.slane %v655_v12, 1 }
 0x311   :  { %v662_v37 = vadd.f32 %v661_v42, %v660_v11  ;;  %v657_v16 = vadd.f32 %v656_v15, %v655_v12 }
 0x313   :  { %v663_v17 = vrot.slane %v662_v37, 1  ;;  %v658_v10 = vmul.f32 0.125, %v657_v16 }
 0x315   :  { %v664_v30 = vadd.f32 %v663_v17, %v662_v37  ;;  %v668_v13 = vsel %vm667_vm9, %v658_v10, 0.0 }
 0x317   :  { %v665_v27 = vmul.f32 0.125, %v664_v30 }
 0x319   :  { %v666_v6 = vadd.f32 %v665_v27, %v658_v10  ;;  %v670_v18 = vsel %vm669_vm10, %v665_v27, 0.0 }
 0x31a   :  { %v671_v19 = vadd.f32 %v670_v18, %v668_v13 }
 0x31b   :  { %v673_v23 = vsel %vm672_vm11, %v666_v6, 0.0 }
 0x31c   :  { %v674_v24 = vadd.f32 %v673_v23, %v671_v19 }
 0x31e   :  { %675 = vst [vmem:[#allocation6] sm:$0x1] %v674_v24 }
 0x31f   :  { %903 = shalt.err (!%p900_p0)
}
 0x320   :  { %705 = dma.vmem_to_hbm [thread:$0]  %s703_s9, 16, %s1394_s10, [#allocation5]  }
 0x321   :  { %912 = dma.done.wait [#allocation3], 128  }
 0x322   :  { %913 = vsyncadd [#allocation3], 4294967168 }
 0x323   :  { %914 = dma.done.wait [#allocation5], 144  }
 0x324   :  { %915 = vsyncadd [#allocation5], 4294967152 }
 0x325   :  { %715 = vsyncpa [#allocation3], 1 }
 0x326   :  { %716 = vsyncpa [#allocation5], 1 }

</bundles_post_ra>
